<compile_context>
chip_gen: v7x
topology: tpu7x:2x2x1
jax: 0.10.0
libtpu: 0.0.40
codegen_flags: <defaults>
</compile_context>

<pallas_src>
import math
import functools

import jax
import jax.numpy as jnp
from jax.experimental import pallas as pl
from jax.experimental.pallas import tpu as pltpu


def _dual_tensorcore_chip():
    """True on chips with 2 TensorCores (v7x); v5e/v6e are single-TC."""
    try:
        kind = jax.devices()[0].device_kind.lower()
    except Exception:
        return False
    return ("v7" in kind) or ("7x" in kind)


def _attn_kernel(q_ref, k_ref, v_ref, m_ref, o_ref, *,
                 scale, cdim, heads_per_group, num_groups):
    # Block views (batch dim squeezed by BlockSpec):
    #   q (TQ, H*C) bf16, k/v (S, H*C) bf16, m (TQ, S) f32, o (TQ, H*C) f32
    m = m_ref[...]                      # (TQ, S) additive mask, f32
    group_width = heads_per_group * cdim

    def process_group(q_g, k_g, v_g):
        # q_g: (TQ, GW) bf16; k_g/v_g: (S, GW) bf16  ->  (TQ, GW) f32
        q_g = q_g * scale               # hoisted scale: one pass per group slab
        outs = []
        for i in range(heads_per_group):
            lo = i * cdim
            q = q_g[:, lo:lo + cdim]    # (TQ, C) bf16
            k = k_g[:, lo:lo + cdim]    # (S,  C) bf16
            v = v_g[:, lo:lo + cdim]    # (S,  C) bf16

            # scores: contract channel axes directly (no materialized k.T), f32 acc
            s = jax.lax.dot_general(q, k, (((1,), (1,)), ((), ())),
                                    preferred_element_type=jnp.float32)  # (TQ, S)
            s = s + m

            # numerically-stable softmax; normalize AFTER the PV matmul
            s = s - jnp.max(s, axis=-1, keepdims=True)
            p = jnp.exp(s)                                   # (TQ, S) f32
            l = jnp.sum(p, axis=-1, keepdims=True)           # (TQ, 1) f32

            o = jnp.dot(p.astype(jnp.bfloat16), v,
                        preferred_element_type=jnp.float32)  # (TQ, C) f32
            o = o * pl.reciprocal(l, approx=True)            # EUP, (TQ, C) mults
            outs.append(o)
        if heads_per_group == 1:
            return outs[0]
        return jnp.concatenate(outs, axis=-1)                # <=128 lanes wide

    if num_groups <= 8:
        # Small head count (and the test path): static unroll, static aligned slices.
        for g in range(num_groups):
            off = g * group_width
            o_ref[:, off:off + group_width] = process_group(
                q_ref[:, off:off + group_width],
                k_ref[:, off:off + group_width],
                v_ref[:, off:off + group_width]).astype(o_ref.dtype)
    else:
        # Large head count (e.g. H=56): bounded live ranges via fori_loop +
        # lane-aligned dynamic ref slices.
        def body(g, carry):
            off = pl.multiple_of(g * group_width, group_width)
            grp = pl.ds(off, group_width)
            o_ref[:, grp] = process_group(
                q_ref[:, grp], k_ref[:, grp], v_ref[:, grp]).astype(o_ref.dtype)
            return carry
        jax.lax.fori_loop(0, num_groups, body, None)


def attention_pallas(Q, K, V, mask):
    """Q, K, V: (B, S, H, C) float32; mask: (1, S, S) float32 (additive).
    Returns (B, S, H, C) float32, matching the PyTorch forward."""
    B, S, H, C = Q.shape
    HC = H * C
    scale = 1.0 / math.sqrt(C)

    # Free trailing-dim merges + bf16 cast for the MXU operands (halves HBM traffic).
    qf = Q.reshape(B, S, HC).astype(jnp.bfloat16)
    kf = K.reshape(B, S, HC).astype(jnp.bfloat16)
    vf = V.reshape(B, S, HC).astype(jnp.bfloat16)
    mf = mask.astype(jnp.float32)

    # Head grouping so every lane slice / store is 128-lane aligned when possible.
    if C <= 128 and 128 % C == 0 and H % (128 // C) == 0:
        heads_per_group = 128 // C
    else:
        heads_per_group = 1
    num_groups = H // heads_per_group

    # Query-tile split only pays off on dual-TC chips (v7x); bf16 sublane tile is 16.
    nq = 2 if (_dual_tensorcore_chip() and S % 2 == 0 and (S // 2) % 16 == 0) else 1
    tq = S // nq

    kernel = functools.partial(_attn_kernel, scale=scale, cdim=C,
                               heads_per_group=heads_per_group,
                               num_groups=num_groups)

    out_f = pl.pallas_call(
        kernel,
        out_shape=jax.ShapeDtypeStruct((B, S, HC), jnp.float32),
        grid_spec=pltpu.PrefetchScalarGridSpec(
            num_scalar_prefetch=0,
            grid=(B, nq),
            in_specs=[
                pl.BlockSpec((None, tq, HC), lambda b, g: (b, g, 0)),  # Q tile
                pl.BlockSpec((None, S, HC), lambda b, g: (b, 0, 0)),   # K (full seq)
                pl.BlockSpec((None, S, HC), lambda b, g: (b, 0, 0)),   # V (full seq)
                pl.BlockSpec((None, tq, S), lambda b, g: (0, g, 0)),   # mask (bcast B,H)
            ],
            out_specs=pl.BlockSpec((None, tq, HC), lambda b, g: (b, g, 0)),
        ),
        compiler_params=pltpu.CompilerParams(
            dimension_semantics=("parallel", "parallel"),
            vmem_limit_bytes=48 * 1024 * 1024),
    )(qf, kf, vf, mf)

    # Free reshape back to the PyTorch einsum layout 'bqnc'.
    return out_f.reshape(B, S, H, C)


def attention_ref(Q, K, V, mask):
    C = Q.shape[-1]
    qk = jnp.einsum('bqnc,bknc->bnqk', Q, K) / math.sqrt(C)
    qk = qk + mask[:, None, :, :]
    w = jax.nn.softmax(qk, axis=-1)
    return jnp.einsum('bnqk,bknc->bqnc', w, V)


if __name__ == "__main__":
    # Small shapes consistent with (b, q=k, n, c); H*C = 128 keeps the merged last
    # dim lane-dense for the flattened (B, S, H*C) layout.
    B, S, H, C = 2, 16, 4, 32
    key = jax.random.PRNGKey(0)
    kq, kk, kv, km = jax.random.split(key, 4)

    Q = jax.random.normal(kq, (B, S, H, C), dtype=jnp.float32)
    K = jax.random.normal(kk, (B, S, H, C), dtype=jnp.float32)
    V = jax.random.normal(kv, (B, S, H, C), dtype=jnp.float32)
    # additive attention mask: -1e9 where rand > 0.7, else 0; broadcast over b, n
    mask = jnp.where(jax.random.uniform(km, (1, S, S)) > 0.7, -1e9, 0.0).astype(jnp.float32)

    out = jax.jit(attention_pallas)(Q, K, V, mask)
    out = jax.block_until_ready(out)

    ref = attention_ref(Q, K, V, mask)
    assert out.shape == (B, S, H, C)
    # bf16 MXU operands + approx reciprocal vs f32 reference -> relaxed tolerance.
    max_err = float(jnp.max(jnp.abs(out - ref)))
    assert jnp.allclose(out, ref, atol=5e-2, rtol=5e-2), f"max abs err {max_err}"

    print("KERNEL_OK")
</pallas_src>

<mosaic_0001>
module attributes {stable_mosaic.version = 11 : i64} {
  func.func @_attn_kernel(%arg0: i32, %arg1: i32, %arg2: memref<1x16x128xbf16, #tpu.memory_space<vmem>>, %arg3: memref<1x16x128xbf16, #tpu.memory_space<vmem>>, %arg4: memref<1x16x128xbf16, #tpu.memory_space<vmem>>, %arg5: memref<1x16x16xf32, #tpu.memory_space<vmem>>, %arg6: memref<1x16x128xf32, #tpu.memory_space<vmem>>) attributes {dimension_semantics = [#tpu.dimension_semantics<parallel>, #tpu.dimension_semantics<parallel>], iteration_bounds = array<i64: 2, 1>, scalar_prefetch = 0 : i64, scratch_operands = 0 : i64, tpu.core_type = #tpu.core_type<tc>, window_params = [{transform_indices = @transform_0, window_bounds = array<i64: 1, 16, 128>}, {transform_indices = @transform_1, window_bounds = array<i64: 1, 16, 128>}, {transform_indices = @transform_2, window_bounds = array<i64: 1, 16, 128>}, {transform_indices = @transform_3, window_bounds = array<i64: 1, 16, 16>}, {transform_indices = @transform_4, window_bounds = array<i64: 1, 16, 128>}]} {
    %c0 = arith.constant 0 : index
    %c0_0 = arith.constant 0 : index
    %c0_1 = arith.constant 0 : index
    %0 = vector.load %arg5[%c0, %c0_0, %c0_1] : memref<1x16x16xf32, #tpu.memory_space<vmem>>, vector<1x16x16xf32>
    %1 = vector.shape_cast %0 : vector<1x16x16xf32> to vector<16x16xf32>
    %c0_2 = arith.constant 0 : index
    %c0_3 = arith.constant 0 : index
    %c0_4 = arith.constant 0 : index
    %2 = vector.load %arg2[%c0_2, %c0_3, %c0_4] : memref<1x16x128xbf16, #tpu.memory_space<vmem>>, vector<1x16x128xbf16>
    %3 = vector.shape_cast %2 : vector<1x16x128xbf16> to vector<16x128xbf16>
    %c0_5 = arith.constant 0 : index
    %c0_6 = arith.constant 0 : index
    %c0_7 = arith.constant 0 : index
    %4 = vector.load %arg3[%c0_5, %c0_6, %c0_7] : memref<1x16x128xbf16, #tpu.memory_space<vmem>>, vector<1x16x128xbf16>
    %5 = vector.shape_cast %4 : vector<1x16x128xbf16> to vector<16x128xbf16>
    %c0_8 = arith.constant 0 : index
    %c0_9 = arith.constant 0 : index
    %c0_10 = arith.constant 0 : index
    %6 = vector.load %arg4[%c0_8, %c0_9, %c0_10] : memref<1x16x128xbf16, #tpu.memory_space<vmem>>, vector<1x16x128xbf16>
    %7 = vector.shape_cast %6 : vector<1x16x128xbf16> to vector<16x128xbf16>
    %cst = arith.constant 1.767580e-01 : bf16
    %8 = vector.broadcast %cst : bf16 to vector<16x128xbf16>
    %9 = arith.mulf %3, %8 : vector<16x128xbf16>
    %10 = vector.extract_strided_slice %9 {offsets = [0, 0], sizes = [16, 32], strides = [1, 1]} : vector<16x128xbf16> to vector<16x32xbf16>
    %11 = vector.extract_strided_slice %5 {offsets = [0, 0], sizes = [16, 32], strides = [1, 1]} : vector<16x128xbf16> to vector<16x32xbf16>
    %12 = vector.extract_strided_slice %7 {offsets = [0, 0], sizes = [16, 32], strides = [1, 1]} : vector<16x128xbf16> to vector<16x32xbf16>
    %cst_11 = arith.constant dense<0.000000e+00> : vector<16x16xf32>
    %13 = tpu.matmul %10, %11, %cst_11 {dimension_numbers = #tpu.dot_dimension_numbers<[1], [1], [0], [0], [0, 0, 1, 0], [], []>} : vector<16x32xbf16>, vector<16x32xbf16>, vector<16x16xf32> -> vector<16x16xf32>
    %14 = arith.addf %13, %1 : vector<16x16xf32>
    %cst_12 = arith.constant dense<0xFF800000> : vector<16xf32>
    %15 = vector.multi_reduction <maximumf>, %14, %cst_12 [1] : vector<16x16xf32> to vector<16xf32>
    %16 = vector.shape_cast %15 : vector<16xf32> to vector<16x1xf32>
    %17 = vector.broadcast %16 : vector<16x1xf32> to vector<16x16xf32>
    %18 = arith.subf %14, %17 : vector<16x16xf32>
    %19 = math.exp %18 : vector<16x16xf32>
    %cst_13 = arith.constant dense<0.000000e+00> : vector<16xf32>
    %20 = vector.multi_reduction <add>, %19, %cst_13 [1] : vector<16x16xf32> to vector<16xf32>
    %21 = vector.shape_cast %20 : vector<16xf32> to vector<16x1xf32>
    %22 = arith.truncf %19 : vector<16x16xf32> to vector<16x16xbf16>
    %cst_14 = arith.constant dense<0.000000e+00> : vector<16x32xf32>
    %23 = tpu.matmul %22, %12, %cst_14 {dimension_numbers = #tpu.dot_dimension_numbers<[1], [0], [0], [1], [0, 0, 1, 1], [], []>} : vector<16x16xbf16>, vector<16x32xbf16>, vector<16x32xf32> -> vector<16x32xf32>
    %24 = tpu.reciprocal %21 {approx = true} : vector<16x1xf32> -> vector<16x1xf32>
    %25 = vector.broadcast %24 : vector<16x1xf32> to vector<16x32xf32>
    %26 = arith.mulf %23, %25 : vector<16x32xf32>
    %27 = vector.extract_strided_slice %9 {offsets = [0, 32], sizes = [16, 32], strides = [1, 1]} : vector<16x128xbf16> to vector<16x32xbf16>
    %28 = vector.extract_strided_slice %5 {offsets = [0, 32], sizes = [16, 32], strides = [1, 1]} : vector<16x128xbf16> to vector<16x32xbf16>
    %29 = vector.extract_strided_slice %7 {offsets = [0, 32], sizes = [16, 32], strides = [1, 1]} : vector<16x128xbf16> to vector<16x32xbf16>
    %cst_15 = arith.constant dense<0.000000e+00> : vector<16x16xf32>
    %30 = tpu.matmul %27, %28, %cst_15 {dimension_numbers = #tpu.dot_dimension_numbers<[1], [1], [0], [0], [0, 0, 1, 0], [], []>} : vector<16x32xbf16>, vector<16x32xbf16>, vector<16x16xf32> -> vector<16x16xf32>
    %31 = arith.addf %30, %1 : vector<16x16xf32>
    %cst_16 = arith.constant dense<0xFF800000> : vector<16xf32>
    %32 = vector.multi_reduction <maximumf>, %31, %cst_16 [1] : vector<16x16xf32> to vector<16xf32>
    %33 = vector.shape_cast %32 : vector<16xf32> to vector<16x1xf32>
    %34 = vector.broadcast %33 : vector<16x1xf32> to vector<16x16xf32>
    %35 = arith.subf %31, %34 : vector<16x16xf32>
    %36 = math.exp %35 : vector<16x16xf32>
    %cst_17 = arith.constant dense<0.000000e+00> : vector<16xf32>
    %37 = vector.multi_reduction <add>, %36, %cst_17 [1] : vector<16x16xf32> to vector<16xf32>
    %38 = vector.shape_cast %37 : vector<16xf32> to vector<16x1xf32>
    %39 = arith.truncf %36 : vector<16x16xf32> to vector<16x16xbf16>
    %cst_18 = arith.constant dense<0.000000e+00> : vector<16x32xf32>
    %40 = tpu.matmul %39, %29, %cst_18 {dimension_numbers = #tpu.dot_dimension_numbers<[1], [0], [0], [1], [0, 0, 1, 1], [], []>} : vector<16x16xbf16>, vector<16x32xbf16>, vector<16x32xf32> -> vector<16x32xf32>
    %41 = tpu.reciprocal %38 {approx = true} : vector<16x1xf32> -> vector<16x1xf32>
    %42 = vector.broadcast %41 : vector<16x1xf32> to vector<16x32xf32>
    %43 = arith.mulf %40, %42 : vector<16x32xf32>
    %44 = vector.extract_strided_slice %9 {offsets = [0, 64], sizes = [16, 32], strides = [1, 1]} : vector<16x128xbf16> to vector<16x32xbf16>
    %45 = vector.extract_strided_slice %5 {offsets = [0, 64], sizes = [16, 32], strides = [1, 1]} : vector<16x128xbf16> to vector<16x32xbf16>
    %46 = vector.extract_strided_slice %7 {offsets = [0, 64], sizes = [16, 32], strides = [1, 1]} : vector<16x128xbf16> to vector<16x32xbf16>
    %cst_19 = arith.constant dense<0.000000e+00> : vector<16x16xf32>
    %47 = tpu.matmul %44, %45, %cst_19 {dimension_numbers = #tpu.dot_dimension_numbers<[1], [1], [0], [0], [0, 0, 1, 0], [], []>} : vector<16x32xbf16>, vector<16x32xbf16>, vector<16x16xf32> -> vector<16x16xf32>
    %48 = arith.addf %47, %1 : vector<16x16xf32>
    %cst_20 = arith.constant dense<0xFF800000> : vector<16xf32>
    %49 = vector.multi_reduction <maximumf>, %48, %cst_20 [1] : vector<16x16xf32> to vector<16xf32>
    %50 = vector.shape_cast %49 : vector<16xf32> to vector<16x1xf32>
    %51 = vector.broadcast %50 : vector<16x1xf32> to vector<16x16xf32>
    %52 = arith.subf %48, %51 : vector<16x16xf32>
    %53 = math.exp %52 : vector<16x16xf32>
    %cst_21 = arith.constant dense<0.000000e+00> : vector<16xf32>
    %54 = vector.multi_reduction <add>, %53, %cst_21 [1] : vector<16x16xf32> to vector<16xf32>
    %55 = vector.shape_cast %54 : vector<16xf32> to vector<16x1xf32>
    %56 = arith.truncf %53 : vector<16x16xf32> to vector<16x16xbf16>
    %cst_22 = arith.constant dense<0.000000e+00> : vector<16x32xf32>
    %57 = tpu.matmul %56, %46, %cst_22 {dimension_numbers = #tpu.dot_dimension_numbers<[1], [0], [0], [1], [0, 0, 1, 1], [], []>} : vector<16x16xbf16>, vector<16x32xbf16>, vector<16x32xf32> -> vector<16x32xf32>
    %58 = tpu.reciprocal %55 {approx = true} : vector<16x1xf32> -> vector<16x1xf32>
    %59 = vector.broadcast %58 : vector<16x1xf32> to vector<16x32xf32>
    %60 = arith.mulf %57, %59 : vector<16x32xf32>
    %61 = vector.extract_strided_slice %9 {offsets = [0, 96], sizes = [16, 32], strides = [1, 1]} : vector<16x128xbf16> to vector<16x32xbf16>
    %62 = vector.extract_strided_slice %5 {offsets = [0, 96], sizes = [16, 32], strides = [1, 1]} : vector<16x128xbf16> to vector<16x32xbf16>
    %63 = vector.extract_strided_slice %7 {offsets = [0, 96], sizes = [16, 32], strides = [1, 1]} : vector<16x128xbf16> to vector<16x32xbf16>
    %cst_23 = arith.constant dense<0.000000e+00> : vector<16x16xf32>
    %64 = tpu.matmul %61, %62, %cst_23 {dimension_numbers = #tpu.dot_dimension_numbers<[1], [1], [0], [0], [0, 0, 1, 0], [], []>} : vector<16x32xbf16>, vector<16x32xbf16>, vector<16x16xf32> -> vector<16x16xf32>
    %65 = arith.addf %64, %1 : vector<16x16xf32>
    %cst_24 = arith.constant dense<0xFF800000> : vector<16xf32>
    %66 = vector.multi_reduction <maximumf>, %65, %cst_24 [1] : vector<16x16xf32> to vector<16xf32>
    %67 = vector.shape_cast %66 : vector<16xf32> to vector<16x1xf32>
    %68 = vector.broadcast %67 : vector<16x1xf32> to vector<16x16xf32>
    %69 = arith.subf %65, %68 : vector<16x16xf32>
    %70 = math.exp %69 : vector<16x16xf32>
    %cst_25 = arith.constant dense<0.000000e+00> : vector<16xf32>
    %71 = vector.multi_reduction <add>, %70, %cst_25 [1] : vector<16x16xf32> to vector<16xf32>
    %72 = vector.shape_cast %71 : vector<16xf32> to vector<16x1xf32>
    %73 = arith.truncf %70 : vector<16x16xf32> to vector<16x16xbf16>
    %cst_26 = arith.constant dense<0.000000e+00> : vector<16x32xf32>
    %74 = tpu.matmul %73, %63, %cst_26 {dimension_numbers = #tpu.dot_dimension_numbers<[1], [0], [0], [1], [0, 0, 1, 1], [], []>} : vector<16x16xbf16>, vector<16x32xbf16>, vector<16x32xf32> -> vector<16x32xf32>
    %75 = tpu.reciprocal %72 {approx = true} : vector<16x1xf32> -> vector<16x1xf32>
    %76 = vector.broadcast %75 : vector<16x1xf32> to vector<16x32xf32>
    %77 = arith.mulf %74, %76 : vector<16x32xf32>
    %78 = tpu.concatenate %26, %43, %60, %77 in 1 : vector<16x32xf32>, vector<16x32xf32>, vector<16x32xf32>, vector<16x32xf32> -> vector<16x128xf32>
    %c0_27 = arith.constant 0 : index
    %c0_28 = arith.constant 0 : index
    %c0_29 = arith.constant 0 : index
    %79 = vector.load %arg6[%c0_27, %c0_28, %c0_29] : memref<1x16x128xf32, #tpu.memory_space<vmem>>, vector<1x16x128xf32>
    %80 = vector.shape_cast %79 : vector<1x16x128xf32> to vector<16x128xf32>
    %81 = vector.shape_cast %78 : vector<16x128xf32> to vector<1x16x128xf32>
    tpu.vector_store %arg6[%c0_27, %c0_28, %c0_29], %81 {strides = array<i32>} : memref<1x16x128xf32, #tpu.memory_space<vmem>>, vector<1x16x128xf32>,
    return
  }
  func.func @transform_0(%arg0: i32, %arg1: i32) -> (i32, i32, i32) {
    %c0_i32 = arith.constant 0 : i32
    %c0_i32_0 = arith.constant 0 : i32
    return %arg0, %arg1, %c0_i32 : i32, i32, i32
  }
  func.func @transform_1(%arg0: i32, %arg1: i32) -> (i32, i32, i32) {
    %c0_i32 = arith.constant 0 : i32
    %c0_i32_0 = arith.constant 0 : i32
    %c0_i32_1 = arith.constant 0 : i32
    return %arg0, %c0_i32, %c0_i32_0 : i32, i32, i32
  }
  func.func @transform_2(%arg0: i32, %arg1: i32) -> (i32, i32, i32) {
    %c0_i32 = arith.constant 0 : i32
    %c0_i32_0 = arith.constant 0 : i32
    %c0_i32_1 = arith.constant 0 : i32
    return %arg0, %c0_i32, %c0_i32_0 : i32, i32, i32
  }
  func.func @transform_3(%arg0: i32, %arg1: i32) -> (i32, i32, i32) {
    %c0_i32 = arith.constant 0 : i32
    %c0_i32_0 = arith.constant 0 : i32
    %c0_i32_1 = arith.constant 0 : i32
    return %c0_i32, %arg1, %c0_i32_0 : i32, i32, i32
  }
  func.func @transform_4(%arg0: i32, %arg1: i32) -> (i32, i32, i32) {
    %c0_i32 = arith.constant 0 : i32
    %c0_i32_0 = arith.constant 0 : i32
    return %arg0, %arg1, %c0_i32 : i32, i32, i32
  }
}

</mosaic_0001>

<bundles_post_ra>
// kernel: attention_pallas.1
= control target key start
LH: loop header
LB: loop body
LE: loop exit
PB: predicated region body
PF: predicated region fallthrough
CT: control target
= control target key end

     0   :  { %s1178_s15 = smov 0   ;;  %s1180_s16 = smov 0   ;;  %s1333_s0 = inlined_call_operand.vmem [shape: bf16[2,16,128], index: 0, kind: input, shape index: {}]   ;;  %s1334_s1 = inlined_call_operand.vmem [shape: bf16[2,16,128], index: 1, kind: input, shape index: {}]   ;;  %s1335_s2 = inlined_call_operand.vmem [shape: bf16[2,16,128], index: 2, kind: input, shape index: {}]   ;;  %s1336_s3 = inlined_call_operand.vmem [shape: f32[1,16,16], index: 3, kind: input, shape index: {}]   ;;  %s1337_s4 = inlined_call_operand.vmem [shape: f32[2,16,128], index: 4, kind: output, shape index: {}]  }
   0x1   :  { %s1182_s17 = smov 0  }
   0x2 LB: > { %s26_s18 = sadd.s32 1, %s1142_s16  ;;  %p971_p0 = scmp.ge.s32.totalorder %s1146_s17, 1  ;;  %s1146_s17 = sphi %s1182_s17, %s14_s17   ;;  %s1142_s16 = sphi %s1180_s16, %s1339_s16   ;;  %s1138_s15 = sphi %s1178_s15, %s1338_s15  }
   0x3   : > { %p28_p1 = scmp.ge.s32.totalorder %s26_s18, 2  ;;  %p214_p2 = scmp.lt.s32.totalorder %s1146_s17, 3 }
   0x5   : > { %s1341_s18 = smov (%p28_p1, %s26_s18), 0  ;;  %p215_p3 = pnand %p971_p0, %p214_p2 }
   0x6   : > { %p264_p4 = scmp.lt.s32.totalorder (!%p215_p3), %s1138_s15, 1  ;;  %v1148_v0 = vmov (!%p215_p3), 0.0   ;;  %vm1149_vm0 = vmmov (!%p215_p3), 0   ;;  %vm321_vm1 = vcmask (!%p215_p3), 261120   ;;  %s1150_s26 = smov (!%p215_p3), 96   ;;  %v1228_v8 = vld [vmem:[%s1336_s3] sm:$0xff] (!%p215_p3) }
   0x7   : > { %218 = sbr.rel (%p215_p3) target bundleno = 1184 (0x4a0), region = 36  ;;  %1013 = vmatprep.subr.bf16.mxu0 (!%p215_p3), %v1148_v0  ;;  %1015 = vmatprep.mubr.msk.bf16.mxu0 (!%p215_p3), %vm1149_vm0, %v1148_v0  ;;  %s1151_s27 = smov (!%p215_p3), 64   ;;  %v1233_v10 = vld [vmem:[%s1336_s3 + $0x8] sm:$0xff] (!%p215_p3)  ;;  %vm369_vm2 = vcmask (!%p215_p3), 130048   ;;  %vm832_vm3 = vcmask (!%p215_p3), 523264   ;;  %vm835_vm4 = vcmask (!%p215_p3), 785408  }
   0x8   : > { %1019 = vmatprep.subr.bf16.mxu1 (!%p215_p3), %v1148_v0  ;;  %1021 = vmatprep.mubr.msk.bf16.mxu1 (!%p215_p3), %vm1149_vm0, %v1148_v0  ;;  %s1152_s28 = smov (!%p215_p3), 32  }
   0xe   : > { %s1343_s15 = smov (!%p264_p4, %s1138_s15), 1 }
   0xf   : > { %s1205_s19 = sshll.u32 %s1343_s15, 3  ;;  %s996_s10 = sshll.u32 %s1343_s15, 4 }
  0x10   : > { %s277_s22 = scalar_lea.vmem %s1334_s1, %s1205_s19  ;;  %s271_s25 = scalar_lea.vmem %s1333_s0, %s1205_s19 }
  0x11   : > { %v1090_v1 = vld [vmem:[%s277_s22] sm:$0xff]   ;;  %s282_s9 = scalar_lea.vmem %s1335_s2, %s1205_s19  ;;  %s297_s13 = scalar_lea.vmem %s1337_s4, %s996_s10 }
  0x12   : > { %v303_v2 = vld [vmem:[%s271_s25] sm:$0xf]  ;;  %v304_v3 = vld [vmem:[%s271_s25 + $0x4] sm:$0xf]  ;;  %v326_v4 = vsel %vm321_vm1, %v1090_v1, 0  ;;  %445 = vrot.lane.b32.xlu1 %v1090_v1, %s1150_s26 }
  0x13   : > { %v309_v5 = vmul.bf16 1043676725, %v303_v2  ;;  %v310_v6 = vmul.bf16 1043676725, %v304_v3  ;;  %1014 = vmatpush3.bf16.xpose.msra.mxu0 %v326_v4  ;;  %v1243_v18 = vld [vmem:[%s282_s9] sm:$0xff]  }
  0x14   : > { %1031 = vmatprep.subr.bf16.mxu0 %v1148_v0  ;;  %1020 = vmatpush3.bf16.msra.mxu1 %v1243_v18 }
  0x15   : > { %v980_v7 = vcombine.low %v309_v5, %v310_v6  ;;  %1025 = vmatprep.subr.bf16.mxu1 %v1148_v0 }
  0x17   : > { %443 = vrot.lane.b32.xlu1 %v980_v7, %s1150_s26 }
  0x1a   : > { %1016 = vmatmul.mubr.msk.bf16.vlgmr.msra.gmra.mrb[0].mxu0 %vm321_vm1, %v980_v7 }
  0x1b   : > { %1033 = vmatprep.mubr.msk.bf16.mxu0 %vm1149_vm0, %v1148_v0  ;;  %564 = vrot.lane.b32.xlu1 %v980_v7, %s1151_s27 }
  0x1f   : > { %687 = vrot.lane.b32.xlu1 %v1090_v1, %s1152_s28 }
  0x23   : > { %685 = vrot.lane.b32.xlu1 %v980_v7, %s1152_s28 }
  0x84   : > { %v446_v25 = vpop.permute.xlu1 %445 }
  0x85   : > { %v451_v28 = vsel %vm321_vm1, %v446_v25, 0 }
  0x89   : > { %v444_v30 = vpop.permute.xlu1 %443 }
  0x8d   : > { %v565_v32 = vpop.permute.xlu1 %564 }
  0x91   : > { %v688_v34 = vpop.permute.xlu1 %687 }
  0x92   : > { %v693_v35 = vsel %vm321_vm1, %v688_v34, 0 }
  0x95   : > { %v686_v36 = vpop.permute.xlu1 %685 }
  0xed   : > { %v362_v9 = vpop.f32.mrb[0].mxu0 }
  0xee   : > { %v363_v11 = vadd.f32 %v362_v9, %v1228_v8  ;;  %v1017_v12 = vpop.f32.mrb[1].mxu0 }
  0xef   : > { %v365_v13 = vpop.f32.mrb[2].mxu0 }
  0xf0   : > { %v366_v14 = vadd.f32 %v365_v13, %v1233_v10  ;;  %v1018_v15 = vpop.f32.mrb[3].mxu0  ;;  %v370_v16 = vsel %vm369_vm2, %v363_v11, -inf }
  0xf1   : > { %371 = vmax.xlane.f32.xlu0 %v370_v16 }
  0xf2   : > { %v373_v17 = vsel %vm369_vm2, %v366_v14, -inf }
  0xf5   : > { %374 = vmax.xlane.f32.xlu0 %v373_v17 }
 0x10b   : > { %566 = vrot.lane.b32.xlu0 %v1090_v1, %s1151_s27 }
 0x17e   : > { %v372_v19 = vpop.xlane.xlu0 %371 }
 0x17f   : > { %v376_v20 = vsub.f32 %v363_v11, %v372_v19 }
 0x181   : > { %v378_v21 = vmul.f32 1.442695, %v376_v20 }
 0x182   : > { %v375_v22 = vpop.xlane.xlu0 %374 }
 0x183   : > { %v377_v23 = vsub.f32 %v366_v14, %v375_v22  ;;  %1092 = vpow2.f32 %v378_v21 }
 0x185   : > { %v380_v24 = vmul.f32 1.442695, %v377_v23 }
 0x186   : > { %v567_v31 = vpop.permute.xlu0 %566 }
 0x187   : > { %1094 = vpow2.f32 %v380_v24  ;;  %v572_v33 = vsel %vm321_vm1, %v567_v31, 0 }
 0x18d   : > { %v1248_v26 = vpop.eup %1092 }
 0x191   : > { %v1250_v27 = vpop.eup %1094 }
 0x192   : > { %v388_v29 = vpack.c.bf16 %v1250_v27, %v1248_v26 }
 0x194   : > { %1022 = vmatmul.mubr.msk.bf16.vlgmr.msra.gmra.mrb[0].mxu1 %vm369_vm2, %v388_v29 }
 0x195   : > { %1026 = vmatpush3.bf16.xpose.msra.mxu1 %v451_v28  ;;  %1027 = vmatprep.mubr.msk.bf16.mxu1 %vm1149_vm0, %v1148_v0 }
 0x196   : > { %1037 = vmatprep.subr.bf16.mxu1 %v1148_v0 }
 0x19c   : > { %1028 = vmatmul.mubr.msk.bf16.vlgmr.msra.gmra.mrb[4].mxu1 %vm321_vm1, %v444_v30 }
 0x19d   : > { %1038 = vmatpush3.bf16.xpose.msra.mxu1 %v572_v33  ;;  %1039 = vmatprep.mubr.msk.bf16.mxu1 %vm1149_vm0, %v1148_v0  ;;  %v382_v33 = vsel %vm369_vm2, %v1248_v26, 0.0 }
 0x19e   : > { %1049 = vmatprep.subr.bf16.mxu1 %v1148_v0 }
 0x1a4   : > { %1040 = vmatmul.mubr.msk.bf16.vlgmr.msra.gmra.mrb[8].mxu1 %vm321_vm1, %v565_v32 }
 0x1a5   : > { %1050 = vmatpush3.bf16.xpose.msra.mxu1 %v693_v35  ;;  %1051 = vmatprep.mubr.msk.bf16.mxu1 %vm1149_vm0, %v1148_v0 }
 0x1ac   : > { %1052 = vmatmul.mubr.msk.bf16.vlgmr.msra.gmra.mrb[12].mxu1 %vm321_vm1, %v686_v36 }
 0x267   : > { %v1269_v37 = vpop.f32.mrb[0].mxu1 }
 0x268   : > { %v1023_v38 = vpop.f32.mrb[1].mxu1 }
 0x269   : > { %v1271_v39 = vpop.f32.mrb[2].mxu1 }
 0x26a   : > { %v1024_v40 = vpop.f32.mrb[3].mxu1 }
 0x26f   : > { %v487_v41 = vpop.f32.mrb[4].mxu1 }
 0x270   : > { %v488_v42 = vadd.f32 %v487_v41, %v1228_v8  ;;  %v1029_v43 = vpop.f32.mrb[5].mxu1 }
 0x271   : > { %v490_v44 = vpop.f32.mrb[6].mxu1 }
 0x272   : > { %v491_v45 = vadd.f32 %v490_v44, %v1233_v10  ;;  %v1030_v46 = vpop.f32.mrb[7].mxu1  ;;  %v494_v47 = vsel %vm369_vm2, %v488_v42, -inf }
 0x273   : > { %495 = vmax.xlane.f32.xlu1 %v494_v47 }
 0x274   : > { %v497_v48 = vsel %vm369_vm2, %v491_v45, -inf }
 0x275   : > { %498 = vmax.xlane.f32.xlu0 %v497_v48 }
 0x277   : > { %v608_v49 = vpop.f32.mrb[8].mxu1 }
 0x278   : > { %v609_v50 = vadd.f32 %v608_v49, %v1228_v8  ;;  %v1041_v51 = vpop.f32.mrb[9].mxu1 }
 0x279   : > { %v611_v52 = vpop.f32.mrb[10].mxu1 }
 0x27a   : > { %v612_v53 = vadd.f32 %v611_v52, %v1233_v10  ;;  %v1042_v54 = vpop.f32.mrb[11].mxu1  ;;  %v615_v55 = vsel %vm369_vm2, %v609_v50, -inf }
 0x27b   : > { %616 = vmax.xlane.f32.xlu1 %v615_v55 }
 0x27c   : > { %v618_v56 = vsel %vm369_vm2, %v612_v53, -inf }
 0x27f   : > { %619 = vmax.xlane.f32.xlu1 %v618_v56  ;;  %v729_v57 = vpop.f32.mrb[12].mxu1 }
 0x280   : > { %v730_v58 = vadd.f32 %v729_v57, %v1228_v8  ;;  %v1053_v59 = vpop.f32.mrb[13].mxu1 }
 0x281   : > { %v732_v60 = vpop.f32.mrb[14].mxu1 }
 0x282   : > { %v736_v61 = vsel %vm369_vm2, %v730_v58, -inf  ;;  %v1054_v62 = vpop.f32.mrb[15].mxu1  ;;  %v733_v63 = vadd.f32 %v732_v60, %v1233_v10 }
 0x283   : > { %737 = vmax.xlane.f32.xlu0 %v736_v61 }
 0x284   : > { %v739_v1 = vsel %vm369_vm2, %v733_v63, -inf }
 0x290   : > { %634 = vrot.lane.b32.xlu1 %v1243_v18, %s1151_s27 }
 0x299   : > { %513 = vrot.lane.b32.xlu0 %v1243_v18, %s1150_s26 }
 0x2b4   : > { %740 = vmax.xlane.f32.xlu1 %v739_v1 }
 0x2c5   : > { %755 = vrot.lane.b32.xlu1 %v1243_v18, %s1152_s28 }
 0x300   : > { %v496_v2 = vpop.xlane.xlu1 %495 }
 0x301   : > { %v500_v3 = vsub.f32 %v488_v42, %v496_v2 }
 0x302   : > { %v499_v4 = vpop.xlane.xlu0 %498 }
 0x303   : > { %v502_v5 = vmul.f32 1.442695, %v500_v3  ;;  %v501_v6 = vsub.f32 %v491_v45, %v499_v4 }
 0x305   : > { %1096 = vpow2.f32 %v502_v5  ;;  %v504_v7 = vmul.f32 1.442695, %v501_v6 }
 0x307   : > { %1098 = vpow2.f32 %v504_v7 }
 0x308   : > { %v617_v8 = vpop.xlane.xlu1 %616 }
 0x309   : > { %v621_v9 = vsub.f32 %v609_v50, %v617_v8 }
 0x30b   : > { %v623_v11 = vmul.f32 1.442695, %v621_v9 }
 0x30c   : > { %v620_v12 = vpop.xlane.xlu1 %619 }
 0x30d   : > { %1100 = vpow2.f32 %v623_v11  ;;  %v622_v10 = vsub.f32 %v612_v53, %v620_v12 }
 0x30f   : > { %v1097_v13 = vpop.eup %1096  ;;  %v625_v14 = vmul.f32 1.442695, %v622_v10 }
 0x310   : > { %v738_v15 = vpop.xlane.xlu0 %737  ;;  %v506_v16 = vsel %vm369_vm2, %v1097_v13, 0.0  ;;  %v635_v24 = vpop.permute.xlu1 %634 }
 0x311   : > { %v1099_v17 = vpop.eup %1098  ;;  %1102 = vpow2.f32 %v625_v14  ;;  %v742_v18 = vsub.f32 %v730_v58, %v738_v15  ;;  %507 = vadd.xlane.f32.xlu0 %v506_v16 }
 0x312   : > { %v509_v19 = vsel %vm369_vm2, %v1099_v17, 0.0  ;;  %v512_v22 = vpack.c.bf16 %v1099_v17, %v1097_v13 }
 0x313   : > { %v744_v20 = vmul.f32 1.442695, %v742_v18  ;;  %510 = vadd.xlane.f32.xlu1 %v509_v19 }
 0x314   : > { %v514_v21 = vpop.permute.xlu0 %513 }
 0x315   : > { %1104 = vpow2.f32 %v744_v20  ;;  %1032 = vmatpush3.bf16.msra.mxu0 %v514_v21 }
 0x316   : > { %1043 = vmatprep.subr.bf16.mxu0 %v1148_v0 }
 0x317   : > { %v1101_v23 = vpop.eup %1100 }
 0x318   : > { %1034 = vmatmul.mubr.msk.bf16.vlgmr.msra.gmra.mrb[4].mxu0 %vm369_vm2, %v512_v22  ;;  %v627_v25 = vsel %vm369_vm2, %v1101_v23, 0.0 }
 0x319   : > { %628 = vadd.xlane.f32.xlu0 %v627_v25  ;;  %1044 = vmatpush3.bf16.msra.mxu0 %v635_v24 }
 0x31a   : > { %1045 = vmatprep.mubr.msk.bf16.mxu0 %vm1149_vm0, %v1148_v0  ;;  %1055 = vmatprep.subr.bf16.mxu0 %v1148_v0 }
 0x31b   : > { %v1103_v28 = vpop.eup %1102 }
 0x31c   : > { %v630_v29 = vsel %vm369_vm2, %v1103_v28, 0.0  ;;  %v633_v30 = vpack.c.bf16 %v1103_v28, %v1101_v23 }
 0x31d   : > { %631 = vadd.xlane.f32.xlu0 %v630_v29 }
 0x31f   : > { %v1105_v31 = vpop.eup %1104 }
 0x320   : > { %1046 = vmatmul.mubr.msk.bf16.vlgmr.msra.gmra.mrb[8].mxu0 %vm369_vm2, %v633_v30  ;;  %v748_v32 = vsel %vm369_vm2, %v1105_v31, 0.0 }
 0x321   : > { %749 = vadd.xlane.f32.xlu1 %v748_v32  ;;  %1057 = vmatprep.mubr.msk.bf16.mxu0 %vm1149_vm0, %v1148_v0  ;;  %v385_v0 = vsel %vm369_vm2, %v1250_v27, 0.0 }
 0x325   : > { %383 = vadd.xlane.f32.xlu1 %v382_v33 }
 0x341   : > { %v741_v34 = vpop.xlane.xlu1 %740 }
 0x342   : > { %v743_v35 = vsub.f32 %v733_v63, %v741_v34 }
 0x344   : > { %v746_v36 = vmul.f32 1.442695, %v743_v35 }
 0x345   : > { %v756_v38 = vpop.permute.xlu1 %755 }
 0x346   : > { %1106 = vpow2.f32 %v746_v36  ;;  %1056 = vmatpush3.bf16.msra.mxu0 %v756_v38 }
 0x350   : > { %v1107_v40 = vpop.eup %1106 }
 0x351   : > { %v751_v41 = vsel %vm369_vm2, %v1107_v40, 0.0  ;;  %v754_v42 = vpack.c.bf16 %v1107_v40, %v1105_v31 }
 0x352   : > { %752 = vadd.xlane.f32.xlu0 %v751_v41 }
 0x353   : > { %1058 = vmatmul.mubr.msk.bf16.vlgmr.msra.gmra.mrb[12].mxu0 %vm369_vm2, %v754_v42 }
 0x356   : > { %386 = vadd.xlane.f32.xlu0 %v385_v0 }
 0x39e   : > { %v508_v43 = vpop.xlane.xlu0 %507 }
 0x39f   : > { %1108 = vrcp.f32 %v508_v43 }
 0x3a0   : > { %v511_v26 = vpop.xlane.xlu1 %510 }
 0x3a1   : > { %1110 = vrcp.f32 %v511_v26 }
 0x3a6   : > { %v629_v44 = vpop.xlane.xlu0 %628 }
 0x3a7   : > { %1112 = vrcp.f32 %v629_v44 }
 0x3a9   : > { %v1109_v46 = vpop.eup %1108 }
 0x3aa   : > { %v632_v45 = vpop.xlane.xlu0 %631 }
 0x3ab   : > { %v1111_v50 = vpop.eup %1110  ;;  %1114 = vrcp.f32 %v632_v45 }
 0x3ae   : > { %v750_v61 = vpop.xlane.xlu1 %749 }
 0x3af   : > { %1116 = vrcp.f32 %v750_v61 }
 0x3b1   : > { %v1113_v27 = vpop.eup %1112 }
 0x3b2   : > { %v384_v8 = vpop.xlane.xlu1 %383 }
 0x3b5   : > { %v1115_v59 = vpop.eup %1114 }
 0x3b9   : > { %v1117_v63 = vpop.eup %1116 }
 0x3df   : > { %v753_v62 = vpop.xlane.xlu0 %752 }
 0x3e0   : > { %1118 = vrcp.f32 %v753_v62 }
 0x3e1   : > { %1120 = vrcp.f32 %v384_v8 }
 0x3e3   : > { %v387_v9 = vpop.xlane.xlu0 %386 }
 0x3e4   : > { %1122 = vrcp.f32 %v387_v9 }
 0x3ea   : > { %v1119_v4 = vpop.eup %1118 }
 0x3eb   : > { %v553_v47 = vpop.f32.mrb[4].mxu0  ;;  %v1121_v10 = vpop.eup %1120 }
 0x3ec   : > { %v562_v48 = vmul.f32 %v1109_v46, %v553_v47  ;;  %v1035_v49 = vpop.f32.mrb[5].mxu0  ;;  %v441_v15 = vmul.f32 %v1121_v10, %v1269_v37 }
 0x3ed   : > { %v556_v51 = vpop.f32.mrb[6].mxu0 }
 0x3ee   : > { %v563_v52 = vmul.f32 %v1111_v50, %v556_v51  ;;  %808 = vrot.lane.b32.xlu1 %v562_v48, %s1152_s28  ;;  %v1036_v53 = vpop.f32.mrb[7].mxu0  ;;  %v1123_v13 = vpop.eup %1122 }
 0x3ef   : > { %v442_v18 = vmul.f32 %v1123_v13, %v1271_v39 }
 0x3f0   : > { %810 = vrot.lane.b32.xlu0 %v563_v52, %s1152_s28 }
 0x3f3   : > { %v674_v54 = vpop.f32.mrb[8].mxu0 }
 0x3f4   : > { %v683_v55 = vmul.f32 %v1113_v27, %v674_v54  ;;  %v1047_v56 = vpop.f32.mrb[9].mxu0 }
 0x3f5   : > { %v677_v57 = vpop.f32.mrb[10].mxu0 }
 0x3f6   : > { %816 = vrot.lane.b32.xlu1 %v683_v55, %s1151_s27  ;;  %v1048_v58 = vpop.f32.mrb[11].mxu0  ;;  %v684_v60 = vmul.f32 %v1115_v59, %v677_v57 }
 0x3fa   : > { %818 = vrot.lane.b32.xlu1 %v684_v60, %s1151_s27 }
 0x426   : > { %v795_v1 = vpop.f32.mrb[12].mxu0 }
 0x427   : > { %v804_v2 = vmul.f32 %v1117_v63, %v795_v1  ;;  %v1059_v3 = vpop.f32.mrb[13].mxu0 }
 0x428   : > { %v798_v5 = vpop.f32.mrb[14].mxu0 }
 0x429   : > { %v805_v6 = vmul.f32 %v1119_v4, %v798_v5  ;;  %824 = vrot.lane.b32.xlu0 %v804_v2, %s1150_s26  ;;  %v1060_v7 = vpop.f32.mrb[15].mxu0 }
 0x42b   : > { %826 = vrot.lane.b32.xlu1 %v805_v6, %s1150_s26 }
 0x460   : > { %v809_v11 = vpop.permute.xlu1 %808 }
 0x461   : > { %v830_v17 = vsel %vm321_vm1, %v441_v15, %v809_v11 }
 0x462   : > { %v811_v14 = vpop.permute.xlu0 %810 }
 0x463   : > { %v831_v21 = vsel %vm321_vm1, %v442_v18, %v811_v14 }
 0x468   : > { %v817_v12 = vpop.permute.xlu1 %816 }
 0x469   : > { %v833_v19 = vsel %vm832_vm3, %v830_v17, %v817_v12 }
 0x46c   : > { %v819_v16 = vpop.permute.xlu1 %818 }
 0x46d   : > { %v834_v23 = vsel %vm832_vm3, %v831_v21, %v819_v16 }
 0x49b   : > { %v825_v20 = vpop.permute.xlu0 %824 }
 0x49c   : > { %v836_v22 = vsel %vm835_vm4, %v833_v19, %v825_v20 }
 0x49d   : > { %838 = vst [vmem:[%s297_s13] sm:$0xff] %v836_v22  ;;  %v827_v24 = vpop.permute.xlu1 %826 }
 0x49e   : > { %v837_v37 = vsel %vm835_vm4, %v834_v23, %v827_v24 }
 0x49f   : > { %839 = vst [vmem:[%s297_s13 + $0x8] sm:$0xff] %v837_v37 }
 0x4a0 PF: > { %s14_s17 = sadd.s32 1, %s1146_s17   ;;  %s1338_s15 = smov %s1142_s16 }
 0x4a1   : > { %p11_p5 = scmp.ge.s32.totalorder %s14_s17, 4   ;;  %s1339_s16 = smov %s1341_s18 }
 0x4a3   :  { %13 = sbr.rel (!%p11_p5) target bundleno = 2 (0x2), region = 75 }

</bundles_post_ra>
